<compile_context>
chip_gen: v7x
topology: tpu7x:2x2x1
jax: 0.10.0
libtpu: 0.0.40
codegen_flags: <defaults>
</compile_context>

<pallas_src>
import functools

import jax
import jax.numpy as jnp
from jax.experimental import pallas as pl
from jax.experimental.pallas import tpu as pltpu


# ----------------------------------------------------------------------------
# Fused Pallas kernel: whole BayesianNetwork forward (deterministic / ensemble)
# ----------------------------------------------------------------------------
def _fused_bayes_net_kernel(x_ref, *refs, num_mid_layers, dim, n_classes):
    # refs layout (all VMEM, weights pre-transposed to [in_f, out_f]):
    #   w_skip_all (p, (num_mid+2)*dim-ish)  bf16   -- [W0 | Wx_1 ... | Wx_head]
    #   b0 (1, dim)                          f32
    #   [w_h_k (dim, dim) bf16, b_k (1, dim) f32]  * num_mid_layers
    #   w_h_head (dim, nc) bf16, b_head (1, nc) f32
    #   out_ref (tile_n, nc)                        <- last (no scratch refs)
    out_ref = refs[-1]
    x = x_ref[...]                                            # (tile_n, p) bf16

    # One wide MXU matmul for every skip-connection (and layer 0) contribution.
    skip = jnp.dot(x, refs[0][...],
                   preferred_element_type=jnp.float32)        # (tile_n, S) f32

    # Layer 0: input is x only -> first `dim` columns of the wide product.
    h = jax.nn.sigmoid(skip[:, 0:dim] + refs[1][...])         # (tile_n, dim) f32

    # Middle layers: cat([h, x], 1) @ W.T == h @ W_h + x @ W_x (split matmul;
    # the x @ W_x part is a static lane slice of the precomputed wide product).
    idx = 2
    for k in range(num_mid_layers):
        wh_ref, b_ref = refs[idx], refs[idx + 1]
        idx += 2
        col0 = dim * (k + 1)
        pre = (jnp.dot(h.astype(wh_ref.dtype), wh_ref[...],
                       preferred_element_type=jnp.float32)
               + skip[:, col0:col0 + dim]
               + b_ref[...])
        h = jax.nn.sigmoid(pre)

    # Head (binary classification, n_classes == 1): sigmoid output.
    wh_ref, b_ref = refs[idx], refs[idx + 1]
    col0 = dim * (num_mid_layers + 1)
    pre = (jnp.dot(h.astype(wh_ref.dtype), wh_ref[...],
                   preferred_element_type=jnp.float32)
           + skip[:, col0:col0 + n_classes]
           + b_ref[...])
    out_ref[...] = jax.nn.sigmoid(pre).astype(out_ref.dtype)


# ----------------------------------------------------------------------------
# One-time parameter preparation (constant in eval / ensemble mode)
# ----------------------------------------------------------------------------
def prepare_effective_params(params, p, compute_dtype=jnp.bfloat16):
    """W_eff = weight_mu * sigmoid(lambdal), pre-transposed to [in_f, out_f].
    Skip-connection (and layer-0) column blocks are concatenated into a single
    wide matrix so the kernel does one x @ W_x_all matmul per tile.  Weights are
    cast to bf16 (MXU inputs); biases stay f32.  Run once, reuse across calls."""
    wm0, lam0, b0 = params[0]
    w0 = (wm0 * jax.nn.sigmoid(lam0)).T                         # (p, dim)
    skip_blocks = [w0]
    hidden_ws, biases = [], [b0.reshape(1, -1).astype(jnp.float32)]
    for wm, lam, b in params[1:]:
        w_full = wm * jax.nn.sigmoid(lam)                        # (out, dim + p)
        dim_h = w_full.shape[1] - p
        hidden_ws.append(w_full[:, :dim_h].T.astype(compute_dtype))   # (dim, out)
        skip_blocks.append(w_full[:, dim_h:].T)                        # (p, out)
        biases.append(b.reshape(1, -1).astype(jnp.float32))
    w_skip_all = jnp.concatenate(skip_blocks, axis=1).astype(compute_dtype)

    flat = [w_skip_all, biases[0]]
    for wh, b in zip(hidden_ws[:-1], biases[1:-1]):
        flat += [wh, b]
    flat += [hidden_ws[-1], biases[-1]]
    return tuple(flat)


# ----------------------------------------------------------------------------
# Batch-tile selection: biggest tile fitting a conservative VMEM budget, with
# >=2 grid steps when the batch is big enough (v7x megacore sharding).
# ----------------------------------------------------------------------------
def _pick_tile_n(n, p, skip_cols, dim, nc, vmem_budget_bytes=24 << 20):
    # Rough per-row on-chip footprint: double-buffered bf16 x tile, double-
    # buffered f32 out tile, plus traced f32 intermediates (wide skip product,
    # h, pre-activation) with ~2x slack for compiler temporaries.
    per_row = (2 * 2 * p) + (2 * 4 * nc) + 2 * 4 * (skip_cols + 2 * dim)
    tile_cap = max(8, (vmem_budget_bytes // max(per_row, 1)) // 8 * 8)
    tile_cap = min(tile_cap, 8192)
    if n <= 64:
        return min(tile_cap, ((n + 7) // 8) * 8)
    # >=2 grid steps so the "parallel" batch axis shards across v7x's 2 TCs
    # (no-op on single-TC v5e/v6e).
    half = max(8, (n // 2) // 8 * 8)
    return min(tile_cap, half)


# ----------------------------------------------------------------------------
# Network wrapper: fused pallas_call(s), batch-gridded, no full-batch pad
# ----------------------------------------------------------------------------
def _run_slab(eff_params, x_slab, n_rows, tile_n, num_mid_layers, dim, nc):
    """One gridded pallas_call over the first `n_rows` rows of x_slab
    (n_rows is a multiple of tile_n; x_slab may be longer)."""
    kern = functools.partial(_fused_bayes_net_kernel,
                             num_mid_layers=num_mid_layers, dim=dim,
                             n_classes=nc)
    p = x_slab.shape[1]
    in_specs = [pl.BlockSpec((tile_n, p), lambda i: (i, 0))]
    for arr in eff_params:   # weights/biases: full-array blocks, VMEM-resident
        in_specs.append(pl.BlockSpec(arr.shape, lambda i: (0, 0)))
    return pl.pallas_call(
        kern,
        out_shape=jax.ShapeDtypeStruct((n_rows, nc), jnp.float32),
        grid_spec=pltpu.PrefetchScalarGridSpec(
            num_scalar_prefetch=0,
            grid=(n_rows // tile_n,),
            in_specs=in_specs,
            out_specs=pl.BlockSpec((tile_n, nc), lambda i: (i, 0)),
        ),
        compiler_params=pltpu.CompilerParams(
            dimension_semantics=("parallel",),
            vmem_limit_bytes=48 * 1024 * 1024,   # >v5e 16MiB default, <v7x 64MiB physical
        ),
    )(x_slab, *eff_params)


def bayesian_network_forward(eff_params, x, p):
    """forward(x, sample=False, ensemble=True) in eval mode; binary classification."""
    x2 = x.reshape(-1, p).astype(jnp.bfloat16)   # bf16 stream: halves x HBM traffic
    n = x2.shape[0]
    nc = eff_params[-1].shape[1]
    dim = eff_params[1].shape[1]
    skip_cols = eff_params[0].shape[1]
    num_mid_layers = (len(eff_params) - 4) // 2   # layers between L0 and the head

    tile_n = _pick_tile_n(n, p, skip_cols, dim, nc)
    n_full = (n // tile_n) * tile_n

    outs = []
    if n_full > 0:
        # Gridded call over the full tiles of the UNPADDED batch (no HBM copy).
        outs.append(_run_slab(eff_params, x2, n_full, tile_n,
                              num_mid_layers, dim, nc))
    rem = n - n_full
    if rem > 0:
        # Ragged tail: pad only the tiny tail slice (<= tile_n rows), one step.
        rem_pad = ((rem + 7) // 8) * 8
        x_tail = jnp.pad(x2[n_full:], ((0, rem_pad - rem), (0, 0)))
        tail_out = _run_slab(eff_params, x_tail, rem_pad, rem_pad,
                             num_mid_layers, dim, nc)
        outs.append(tail_out[:rem])

    return outs[0] if len(outs) == 1 else jnp.concatenate(outs, axis=0)
    # TODO(synk): sample=True (local-reparameterization noise), ensemble=False
    # (median-probability model), KL/log-prob bookkeeping and the multiclass
    # log_softmax head are training-time / multiclass variants not exercised by
    # forward() defaults with n_classes=1; not implemented here.


# ----------------------------------------------------------------------------
# Deterministic synthetic init matching the module's parameter shapes
# ----------------------------------------------------------------------------
def init_bayesian_network_params(key, p, dim, hidden_layers, n_classes=1,
                                 lower_init_lambda=-10.0, upper_init_lambda=-7.0):
    layer_shapes = [(dim, p)]
    layer_shapes += [(dim, dim + p) for _ in range(hidden_layers - 1)]
    layer_shapes += [(n_classes, dim + p)]

    params = []
    for (out_f, in_f) in layer_shapes:
        key, k_mu, k_lam, k_b = jax.random.split(key, 4)
        weight_mu = 0.1 * jax.random.normal(k_mu, (out_f, in_f), dtype=jnp.float32)
        lambdal = jax.random.uniform(
            k_lam, (out_f, in_f), dtype=jnp.float32,
            minval=lower_init_lambda, maxval=upper_init_lambda)
        bias_mu = 0.1 * jax.random.normal(k_b, (out_f,), dtype=jnp.float32)
        params.append((weight_mu, lambdal, bias_mu))
    return params


# ----------------------------------------------------------------------------
# Pure-JAX f32 reference for sanity checking (mirrors the PyTorch module)
# ----------------------------------------------------------------------------
def _reference_forward(params, x, p):
    def lin(xi, wm, lam, b):
        w_eff = wm * jax.nn.sigmoid(lam)
        return jnp.dot(xi, w_eff.T, preferred_element_type=jnp.float32) + b
    x_input = x.reshape(-1, p).astype(jnp.float32)
    wm, lam, b = params[0]
    h = jax.nn.sigmoid(lin(x_input, wm, lam, b))
    for (wm, lam, b) in params[1:-1]:
        h = jax.nn.sigmoid(lin(jnp.concatenate([h, x_input], 1), wm, lam, b))
    wm, lam, b = params[-1]
    return jax.nn.sigmoid(lin(jnp.concatenate([h, x_input], 1), wm, lam, b))


if __name__ == "__main__":
    # Small shapes consistent with the module: p input covariates, `dim` hidden
    # units, `hidden_layers` total hidden layers, binary classification head.
    p = 16
    dim = 32
    hidden_layers = 2
    n_classes = 1

    key = jax.random.PRNGKey(0)
    key, k_x1, k_x2 = jax.random.split(key, 3)
    params = init_bayesian_network_params(key, p, dim, hidden_layers, n_classes)

    # One-time prep (constant effective weights in eval / ensemble mode).
    eff_params = jax.block_until_ready(prepare_effective_params(params, p))

    fwd = jax.jit(lambda eff, xx: bayesian_network_forward(eff, xx, p))

    # Case 1: small batch (single tile).
    x_small = jax.random.normal(k_x1, (8, p), dtype=jnp.float32)
    out_small = jax.block_until_ready(fwd(eff_params, x_small))
    ref_small = _reference_forward(params, x_small, p)
    assert out_small.shape == (8, n_classes), out_small.shape
    assert jnp.allclose(out_small, ref_small, atol=1e-2, rtol=1e-2), (
        f"mismatch (small): max abs err = {jnp.max(jnp.abs(out_small - ref_small))}")

    # Case 2: batch that exercises the multi-step grid AND the ragged tail call.
    x_big = jax.random.normal(k_x2, (200, p), dtype=jnp.float32)
    out_big = jax.block_until_ready(fwd(eff_params, x_big))
    ref_big = _reference_forward(params, x_big, p)
    assert out_big.shape == (200, n_classes), out_big.shape
    assert jnp.allclose(out_big, ref_big, atol=1e-2, rtol=1e-2), (
        f"mismatch (big): max abs err = {jnp.max(jnp.abs(out_big - ref_big))}")

    print("KERNEL_OK")
</pallas_src>

<mosaic_0001>
module attributes {stable_mosaic.version = 11 : i64} {
  func.func @_fused_bayes_net_kernel(%arg0: i32, %arg1: memref<8x16xbf16, #tpu.memory_space<vmem>>, %arg2: memref<16x65xbf16, #tpu.memory_space<vmem>>, %arg3: memref<1x32xf32, #tpu.memory_space<vmem>>, %arg4: memref<32x32xbf16, #tpu.memory_space<vmem>>, %arg5: memref<1x32xf32, #tpu.memory_space<vmem>>, %arg6: memref<32x1xbf16, #tpu.memory_space<vmem>>, %arg7: memref<1x1xf32, #tpu.memory_space<vmem>>, %arg8: memref<8x1xf32, #tpu.memory_space<vmem>>) attributes {dimension_semantics = [#tpu.dimension_semantics<parallel>], iteration_bounds = array<i64: 1>, scalar_prefetch = 0 : i64, scratch_operands = 0 : i64, tpu.core_type = #tpu.core_type<tc>, window_params = [{transform_indices = @transform_0, window_bounds = array<i64: 8, 16>}, {pipeline_mode = #tpu.pipeline_mode<synchronous>, transform_indices = @transform_1, window_bounds = array<i64: 16, 65>}, {pipeline_mode = #tpu.pipeline_mode<synchronous>, transform_indices = @transform_2, window_bounds = array<i64: 1, 32>}, {pipeline_mode = #tpu.pipeline_mode<synchronous>, transform_indices = @transform_3, window_bounds = array<i64: 32, 32>}, {pipeline_mode = #tpu.pipeline_mode<synchronous>, transform_indices = @transform_4, window_bounds = array<i64: 1, 32>}, {pipeline_mode = #tpu.pipeline_mode<synchronous>, transform_indices = @transform_5, window_bounds = array<i64: 32, 1>}, {pipeline_mode = #tpu.pipeline_mode<synchronous>, transform_indices = @transform_6, window_bounds = array<i64: 1, 1>}, {transform_indices = @transform_7, window_bounds = array<i64: 8, 1>}]} {
    %c0 = arith.constant 0 : index
    %c0_0 = arith.constant 0 : index
    %0 = vector.load %arg1[%c0, %c0_0] : memref<8x16xbf16, #tpu.memory_space<vmem>>, vector<8x16xbf16>
    %c0_1 = arith.constant 0 : index
    %c0_2 = arith.constant 0 : index
    %1 = vector.load %arg2[%c0_1, %c0_2] : memref<16x65xbf16, #tpu.memory_space<vmem>>, vector<16x65xbf16>
    %cst = arith.constant dense<0.000000e+00> : vector<8x65xf32>
    %2 = tpu.matmul %0, %1, %cst {dimension_numbers = #tpu.dot_dimension_numbers<[1], [0], [0], [1], [0, 0, 1, 1], [], []>} : vector<8x16xbf16>, vector<16x65xbf16>, vector<8x65xf32> -> vector<8x65xf32>
    %3 = vector.extract_strided_slice %2 {offsets = [0, 0], sizes = [8, 32], strides = [1, 1]} : vector<8x65xf32> to vector<8x32xf32>
    %c0_3 = arith.constant 0 : index
    %c0_4 = arith.constant 0 : index
    %4 = vector.load %arg3[%c0_3, %c0_4] : memref<1x32xf32, #tpu.memory_space<vmem>>, vector<1x32xf32>
    %5 = vector.broadcast %4 : vector<1x32xf32> to vector<8x32xf32>
    %6 = arith.addf %3, %5 : vector<8x32xf32>
    %7 = arith.negf %6 : vector<8x32xf32>
    %8 = math.exp %7 : vector<8x32xf32>
    %cst_5 = arith.constant 1.000000e+00 : f32
    %9 = vector.broadcast %cst_5 : f32 to vector<8x32xf32>
    %10 = arith.addf %9, %8 : vector<8x32xf32>
    %11 = arith.divf %9, %10 : vector<8x32xf32>
    %12 = arith.truncf %11 : vector<8x32xf32> to vector<8x32xbf16>
    %c0_6 = arith.constant 0 : index
    %c0_7 = arith.constant 0 : index
    %13 = vector.load %arg4[%c0_6, %c0_7] : memref<32x32xbf16, #tpu.memory_space<vmem>>, vector<32x32xbf16>
    %cst_8 = arith.constant dense<0.000000e+00> : vector<8x32xf32>
    %14 = tpu.matmul %12, %13, %cst_8 {dimension_numbers = #tpu.dot_dimension_numbers<[1], [0], [0], [1], [0, 0, 1, 1], [], []>} : vector<8x32xbf16>, vector<32x32xbf16>, vector<8x32xf32> -> vector<8x32xf32>
    %15 = vector.extract_strided_slice %2 {offsets = [0, 32], sizes = [8, 32], strides = [1, 1]} : vector<8x65xf32> to vector<8x32xf32>
    %16 = arith.addf %14, %15 : vector<8x32xf32>
    %c0_9 = arith.constant 0 : index
    %c0_10 = arith.constant 0 : index
    %17 = vector.load %arg5[%c0_9, %c0_10] : memref<1x32xf32, #tpu.memory_space<vmem>>, vector<1x32xf32>
    %18 = vector.broadcast %17 : vector<1x32xf32> to vector<8x32xf32>
    %19 = arith.addf %16, %18 : vector<8x32xf32>
    %20 = arith.negf %19 : vector<8x32xf32>
    %21 = math.exp %20 : vector<8x32xf32>
    %cst_11 = arith.constant 1.000000e+00 : f32
    %22 = vector.broadcast %cst_11 : f32 to vector<8x32xf32>
    %23 = arith.addf %22, %21 : vector<8x32xf32>
    %24 = arith.divf %22, %23 : vector<8x32xf32>
    %25 = arith.truncf %24 : vector<8x32xf32> to vector<8x32xbf16>
    %c0_12 = arith.constant 0 : index
    %c0_13 = arith.constant 0 : index
    %26 = vector.load %arg6[%c0_12, %c0_13] : memref<32x1xbf16, #tpu.memory_space<vmem>>, vector<32x1xbf16>
    %cst_14 = arith.constant dense<0.000000e+00> : vector<8x1xf32>
    %27 = tpu.matmul %25, %26, %cst_14 {dimension_numbers = #tpu.dot_dimension_numbers<[1], [0], [0], [1], [0, 0, 1, 1], [], []>} : vector<8x32xbf16>, vector<32x1xbf16>, vector<8x1xf32> -> vector<8x1xf32>
    %28 = vector.extract_strided_slice %2 {offsets = [0, 64], sizes = [8, 1], strides = [1, 1]} : vector<8x65xf32> to vector<8x1xf32>
    %29 = arith.addf %27, %28 : vector<8x1xf32>
    %c0_15 = arith.constant 0 : index
    %c0_16 = arith.constant 0 : index
    %30 = vector.load %arg7[%c0_15, %c0_16] : memref<1x1xf32, #tpu.memory_space<vmem>>, vector<1x1xf32>
    %31 = vector.broadcast %30 : vector<1x1xf32> to vector<8x1xf32>
    %32 = arith.addf %29, %31 : vector<8x1xf32>
    %33 = arith.negf %32 : vector<8x1xf32>
    %34 = math.exp %33 : vector<8x1xf32>
    %cst_17 = arith.constant 1.000000e+00 : f32
    %35 = vector.broadcast %cst_17 : f32 to vector<8x1xf32>
    %36 = arith.addf %35, %34 : vector<8x1xf32>
    %37 = arith.divf %35, %36 : vector<8x1xf32>
    %c0_18 = arith.constant 0 : index
    %c0_19 = arith.constant 0 : index
    %38 = vector.load %arg8[%c0_18, %c0_19] : memref<8x1xf32, #tpu.memory_space<vmem>>, vector<8x1xf32>
    tpu.vector_store %arg8[%c0_18, %c0_19], %37 {strides = array<i32>} : memref<8x1xf32, #tpu.memory_space<vmem>>, vector<8x1xf32>,
    return
  }
  func.func @transform_0(%arg0: i32) -> (i32, i32) {
    %c0_i32 = arith.constant 0 : i32
    %c0_i32_0 = arith.constant 0 : i32
    return %arg0, %c0_i32 : i32, i32
  }
  func.func @transform_1(%arg0: i32) -> (i32, i32) {
    %c0_i32 = arith.constant 0 : i32
    %c0_i32_0 = arith.constant 0 : i32
    %c0_i32_1 = arith.constant 0 : i32
    return %c0_i32, %c0_i32_0 : i32, i32
  }
  func.func @transform_2(%arg0: i32) -> (i32, i32) {
    %c0_i32 = arith.constant 0 : i32
    %c0_i32_0 = arith.constant 0 : i32
    %c0_i32_1 = arith.constant 0 : i32
    return %c0_i32, %c0_i32_0 : i32, i32
  }
  func.func @transform_3(%arg0: i32) -> (i32, i32) {
    %c0_i32 = arith.constant 0 : i32
    %c0_i32_0 = arith.constant 0 : i32
    %c0_i32_1 = arith.constant 0 : i32
    return %c0_i32, %c0_i32_0 : i32, i32
  }
  func.func @transform_4(%arg0: i32) -> (i32, i32) {
    %c0_i32 = arith.constant 0 : i32
    %c0_i32_0 = arith.constant 0 : i32
    %c0_i32_1 = arith.constant 0 : i32
    return %c0_i32, %c0_i32_0 : i32, i32
  }
  func.func @transform_5(%arg0: i32) -> (i32, i32) {
    %c0_i32 = arith.constant 0 : i32
    %c0_i32_0 = arith.constant 0 : i32
    %c0_i32_1 = arith.constant 0 : i32
    return %c0_i32, %c0_i32_0 : i32, i32
  }
  func.func @transform_6(%arg0: i32) -> (i32, i32) {
    %c0_i32 = arith.constant 0 : i32
    %c0_i32_0 = arith.constant 0 : i32
    %c0_i32_1 = arith.constant 0 : i32
    return %c0_i32, %c0_i32_0 : i32, i32
  }
  func.func @transform_7(%arg0: i32) -> (i32, i32) {
    %c0_i32 = arith.constant 0 : i32
    %c0_i32_0 = arith.constant 0 : i32
    return %arg0, %c0_i32 : i32, i32
  }
}

</mosaic_0001>

<bundles_post_ra>
// kernel: _lambda_.1
= control target key start
LH: loop header
LB: loop body
LE: loop exit
PB: predicated region body
PF: predicated region fallthrough
CT: control target
= control target key end

     0   :  { %v323_v0 = vmov 0.0   ;;  %vm324_vm0 = vmmov 0   ;;  %vm38_vm1 = vcmask 130048   ;;  %s326_s10 = smov 64   ;;  %vm117_vm2 = vcmask 261120   ;;  %s399_s1 = inlined_call_operand.vmem [shape: bf16[16,65], index: 1, kind: input, shape index: {}]   ;;  %s400_s0 = inlined_call_operand.vmem [shape: bf16[8,16], index: 0, kind: input, shape index: {}]   ;;  %s401_s3 = inlined_call_operand.vmem [shape: bf16[32,32], index: 3, kind: input, shape index: {}]   ;;  %s402_s2 = inlined_call_operand.vmem [shape: f32[1,32], index: 2, kind: input, shape index: {}]   ;;  %s403_s5 = inlined_call_operand.vmem [shape: bf16[32,1], index: 5, kind: input, shape index: {}]   ;;  %s404_s6 = inlined_call_operand.<no memory space> [shape: f32[1,1], index: 6, kind: input, shape index: {}]   ;;  %s405_s4 = inlined_call_operand.vmem [shape: f32[1,32], index: 4, kind: input, shape index: {}]   ;;  %s406_s7 = inlined_call_operand.vmem [shape: f32[8,1], index: 7, kind: output, shape index: {}]  }
   0x1   :  { %280 = vmatprep.subr.bf16.mxu0 %v323_v0  ;;  %v306_v1 = vld [vmem:[%s399_s1] sm:$0xff]   ;;  %282 = vmatprep.mubr.msk.bf16.mxu0 %vm324_vm0, %v323_v0  ;;  %v308_v4 = vld [vmem:[%s401_s3 + $0x8] sm:$0xff]   ;;  %v12_v18 = vstv %s404_s6  ;;  %vm252_vm3 = vcmask 7168  }
   0x2   :  { %286 = vmatprep.subr.bf16.mxu1 %v323_v0  ;;  %290 = vmatprep.mubr.msk.bf16.mxu1 %vm324_vm0, %v323_v0  ;;  %v29_v2 = vld [vmem:[%s400_s0] sm:$0xf]  ;;  %s325_s0 = smov 96   ;;  %v310_v17 = vld [vmem:[%s403_s5 + $0x8] sm:$0xff]   ;;  %13 = vst [vmem:[#allocation2] sm:$0x1] %v12_v18 }
   0x3   :  { %281 = vmatpush3.bf16.msra.mxu0 %v306_v1  ;;  %v307_v3 = vld [vmem:[%s401_s3] sm:$0xff]  }
   0x4   :  { %294 = vmatprep.subr.bf16.mxu0 %v323_v0  ;;  %287 = vmatpush3.bf16.msra.mxu1 %v307_v3  ;;  %v260_v5 = vld [vmem:[%s402_s2] ss:$0 sm:$0xff] }
   0x5   :  { %288 = vmatprep.subr.bf16.mxu1 %v323_v0  ;;  %v309_v16 = vld [vmem:[%s403_s5] sm:$0xff]  }
   0x6   :  { %283 = vmatmul.mubr.msk.bf16.vlgmr.msra.gmra.mrb[0].mxu0 %vm38_vm1, %v29_v2  ;;  %v265_v21 = vld [vmem:[%s405_s4] ss:$0 sm:$0xff] }
   0x7   :  { %298 = vmatprep.mubr.msk.bf16.mxu0 %vm324_vm0, %v323_v0  ;;  %295 = vmatpush3.bf16.msra.mxu0 %v309_v16 }
   0x8   :  { %289 = vmatpush3.bf16.msra.mxu1 %v308_v4  ;;  %296 = vmatprep.subr.bf16.mxu0 %v323_v0 }
   0x9   :  { %v270_v34 = vld [vmem:[#allocation2] ss:$0 sm:$0xff] }
   0xb   :  { %297 = vmatpush3.bf16.msra.mxu0 %v310_v17 }
  0xd9   :  { %v76_v6 = vpop.f32.mrb[0].mxu0 }
  0xda   :  { %v89_v7 = vadd.f32 %v260_v5, %v76_v6  ;;  %114 = vrot.lane.b32.xlu0 %v76_v6, %s325_s0  ;;  %v284_v8 = vpop.f32.mrb[1].mxu0 }
  0xdb   :  { %v79_v9 = vpop.f32.mrb[2].mxu0 }
  0xdc   :  { %v261_v10 = vmul.f32 -1.442695, %v89_v7  ;;  %v285_v11 = vpop.f32.mrb[3].mxu0 }
  0xde   :  { %311 = vpow2.f32 %v261_v10  ;;  %192 = vrot.lane.b32.xlu0 %v76_v6, %s326_s10 }
  0xe8   :  { %v312_v12 = vpop.eup %311 }
  0xe9   :  { %v93_v13 = vadd.f32 1.0, %v312_v12 }
  0xeb   :  { %313 = vrcp.f32 %v93_v13 }
  0xf5   :  { %v314_v14 = vpop.eup %313 }
  0xf6   :  { %v96_v15 = vpack.c.bf16 %v314_v14, %v314_v14 }
  0xf8   :  { %291 = vmatmul.mubr.msk.bf16.vlgmr.msra.gmra.mrb[0].mxu1 %vm117_vm2, %v96_v15 }
 0x14c   :  { %v115_v19 = vpop.permute.xlu0 %114 }
 0x150   :  { %v193_v32 = vpop.permute.xlu0 %192 }
 0x1cb   :  { %v155_v20 = vpop.f32.mrb[0].mxu1 }
 0x1cc   :  { %v156_v22 = vadd.f32 %v155_v20, %v115_v19  ;;  %v292_v23 = vpop.f32.mrb[1].mxu1 }
 0x1cd   :  { %v158_v24 = vpop.f32.mrb[2].mxu1 }
 0x1ce   :  { %v168_v25 = vadd.f32 %v265_v21, %v156_v22  ;;  %v293_v26 = vpop.f32.mrb[3].mxu1 }
 0x1d0   :  { %v266_v27 = vmul.f32 -1.442695, %v168_v25 }
 0x1d2   :  { %315 = vpow2.f32 %v266_v27 }
 0x1dc   :  { %v316_v28 = vpop.eup %315 }
 0x1dd   :  { %v172_v29 = vadd.f32 1.0, %v316_v28 }
 0x1df   :  { %317 = vrcp.f32 %v172_v29 }
 0x1e9   :  { %v318_v30 = vpop.eup %317 }
 0x1ea   :  { %v175_v31 = vpack.c.bf16 %v318_v30, %v318_v30 }
 0x1ec   :  { %299 = vmatmul.mubr.msk.bf16.vlgmr.msra.gmra.mrb[4].mxu0 %vm117_vm2, %v175_v31 }
 0x2bf   :  { %v232_v33 = vpop.f32.mrb[4].mxu0 }
 0x2c0   :  { %v233_v35 = vadd.f32 %v232_v33, %v193_v32  ;;  %v300_v36 = vpop.f32.mrb[5].mxu0 }
 0x2c1   :  { %v235_v37 = vpop.f32.mrb[6].mxu0 }
 0x2c2   :  { %v245_v38 = vadd.f32 %v270_v34, %v233_v35  ;;  %v301_v39 = vpop.f32.mrb[7].mxu0 }
 0x2c4   :  { %v271_v40 = vmul.f32 -1.442695, %v245_v38 }
 0x2c6   :  { %319 = vpow2.f32 %v271_v40 }
 0x2d0   :  { %v320_v41 = vpop.eup %319 }
 0x2d1   :  { %v249_v42 = vadd.f32 1.0, %v320_v41 }
 0x2d3   :  { %321 = vrcp.f32 %v249_v42 }
 0x2dd   :  { %v322_v43 = vpop.eup %321 }
 0x2de   :  { %253 = vst.msk [vmem:[%s406_s7] sm:$0xff] %vm252_vm3, %v322_v43 }

</bundles_post_ra>
